<compile_context>
chip_gen: v6e
topology: v6e:2x2x1
jax: 0.10.0
libtpu: 0.0.40
codegen_flags: <defaults>
</compile_context>

<pallas_src>
import jax
import jax.numpy as jnp
from jax.experimental import pallas as pl
from jax.experimental.pallas import tpu as pltpu

LANES = 128


def _round_up(x, m):
    return ((x + m - 1) // m) * m


def mlp_kernel(x_ref, w1_ref, b1_ref, w2_ref, b2_ref, o_ref):
    # Layer 1: bf16 MXU matmul, f32 accumulation; bias + ReLU in f32 on the VPU.
    h = jnp.dot(x_ref[...], w1_ref[...], preferred_element_type=jnp.float32)
    h = jnp.maximum(h + b1_ref[...], 0.0)          # b1 is (1, Hp) -> broadcasts over rows
    # Layer 2: cast activations to bf16 for the MXU, accumulate in f32.
    y = jnp.dot(h.astype(w2_ref.dtype), w2_ref[...],
                preferred_element_type=jnp.float32)
    o_ref[...] = (y + b2_ref[...]).astype(o_ref.dtype)


def neuralnet_forward(x, w1, b1, w2, b2, *, block_rows=512,
                      compute_dtype=jnp.bfloat16):
    """Forward pass of NeuralNet: y = relu(x @ W1 + b1) @ W2 + b2.

    x : (N, in_size) f32
    w1: (in_size, 32)   b1: (1, 32)      (transposed vs. torch nn.Linear storage)
    w2: (32, out_size)  b2: (1, out_size)
    returns (N, out_size) f32
    """
    N, in_size = x.shape
    hidden = w1.shape[1]
    out_size = w2.shape[1]

    hidden_p = _round_up(max(hidden, LANES), LANES)
    out_p = _round_up(max(out_size, LANES), LANES)

    # Zero-pad the tiny, VMEM-resident weights/biases to lane-dense widths.
    w1_p = jnp.zeros((in_size, hidden_p), compute_dtype).at[:, :hidden].set(
        w1.astype(compute_dtype))
    b1_p = jnp.zeros((1, hidden_p), jnp.float32).at[:, :hidden].set(
        b1.reshape(1, hidden).astype(jnp.float32))
    w2_p = jnp.zeros((hidden_p, out_p), compute_dtype).at[:hidden, :out_size].set(
        w2.astype(compute_dtype))
    b2_p = jnp.zeros((1, out_p), jnp.float32).at[:, :out_size].set(
        b2.reshape(1, out_size).astype(jnp.float32))

    # Batch tile: multiple of 8 sublanes, at most block_rows; pad N up to a multiple.
    tm = min(_round_up(block_rows, 8), _round_up(max(N, 8), 8))
    n_pad = _round_up(N, tm)
    x_p = x.astype(compute_dtype)
    if n_pad != N:
        x_p = jnp.zeros((n_pad, in_size), compute_dtype).at[:N].set(x_p)

    grid = (n_pad // tm,)

    out = pl.pallas_call(
        mlp_kernel,
        out_shape=jax.ShapeDtypeStruct((n_pad, out_p), jnp.float32),
        grid_spec=pltpu.PrefetchScalarGridSpec(
            num_scalar_prefetch=0,
            grid=grid,
            in_specs=[
                pl.BlockSpec((tm, in_size), lambda i: (i, 0)),        # streamed x tiles
                pl.BlockSpec((in_size, hidden_p), lambda i: (0, 0)),  # resident W1
                pl.BlockSpec((1, hidden_p), lambda i: (0, 0)),        # resident b1
                pl.BlockSpec((hidden_p, out_p), lambda i: (0, 0)),    # resident W2
                pl.BlockSpec((1, out_p), lambda i: (0, 0)),           # resident b2
            ],
            out_specs=pl.BlockSpec((tm, out_p), lambda i: (i, 0)),    # lane-dense output
        ),
        compiler_params=pltpu.CompilerParams(
            dimension_semantics=("parallel",),   # shard batch tiles across TCs on v7x
        ),
    )(x_p, w1_p, b1_p, w2_p, b2_p)

    return out[:N, :out_size]


def init_params(key, in_size, hidden, out_size):
    """Deterministic init mimicking nn.Linear's uniform(-1/sqrt(fan_in), 1/sqrt(fan_in))."""
    k1, k2, k3, k4 = jax.random.split(key, 4)
    bound1 = 1.0 / jnp.sqrt(in_size)
    bound2 = 1.0 / jnp.sqrt(hidden)
    w1 = jax.random.uniform(k1, (in_size, hidden), jnp.float32, -bound1, bound1)
    b1 = jax.random.uniform(k2, (1, hidden), jnp.float32, -bound1, bound1)
    w2 = jax.random.uniform(k3, (hidden, out_size), jnp.float32, -bound2, bound2)
    b2 = jax.random.uniform(k4, (1, out_size), jnp.float32, -bound2, bound2)
    return w1, b1, w2, b2


# TODO(synk): step()/SGD-with-weight-decay training update and loss_fn are not part of
# the forward pass and are not implemented here.

if __name__ == "__main__":
    # Small shapes consistent with forward(): x is (N, in_size) -> (N, out_size).
    # block_rows=32 forces a 4-step grid so the batch-tiled pipeline path is exercised.
    N, in_size, hidden, out_size = 128, 16, 32, 4

    key = jax.random.PRNGKey(0)
    kx, kp = jax.random.split(key)
    x = jax.random.normal(kx, (N, in_size), jnp.float32)
    w1, b1, w2, b2 = init_params(kp, in_size, hidden, out_size)

    y = neuralnet_forward(x, w1, b1, w2, b2, block_rows=32)
    jax.block_until_ready(y)
    assert y.shape == (N, out_size)

    # Exact check against a JAX reference using the same bf16-operand / f32-accumulate
    # matmul recipe the kernel uses.
    xb, w1b, w2b = (a.astype(jnp.bfloat16) for a in (x, w1, w2))
    h_ref = jnp.maximum(jnp.dot(xb, w1b, preferred_element_type=jnp.float32) + b1, 0.0)
    ref_bf16 = jnp.dot(h_ref.astype(jnp.bfloat16), w2b,
                       preferred_element_type=jnp.float32) + b2
    assert jnp.allclose(y, ref_bf16, atol=1e-5, rtol=1e-5)

    # Loose check against the full-f32 PyTorch-equivalent forward (bf16 streaming error
    # of a 16->32->4 MLP is << 1e-2 here).
    ref_f32 = jnp.maximum(x @ w1 + b1, 0.0) @ w2 + b2
    assert jnp.allclose(y, ref_f32, atol=1e-2, rtol=1e-2)

    print("KERNEL_OK")
</pallas_src>

<mosaic_0001>
module attributes {stable_mosaic.version = 11 : i64} {
  func.func @mlp_kernel(%arg0: i32, %arg1: memref<32x16xbf16, #tpu.memory_space<vmem>>, %arg2: memref<16x128xbf16, #tpu.memory_space<vmem>>, %arg3: memref<1x128xf32, #tpu.memory_space<vmem>>, %arg4: memref<128x128xbf16, #tpu.memory_space<vmem>>, %arg5: memref<1x128xf32, #tpu.memory_space<vmem>>, %arg6: memref<32x128xf32, #tpu.memory_space<vmem>>) attributes {dimension_semantics = [#tpu.dimension_semantics<parallel>], iteration_bounds = array<i64: 4>, scalar_prefetch = 0 : i64, scratch_operands = 0 : i64, tpu.core_type = #tpu.core_type<tc>, window_params = [{transform_indices = @transform_0, window_bounds = array<i64: 32, 16>}, {pipeline_mode = #tpu.pipeline_mode<synchronous>, transform_indices = @transform_1, window_bounds = array<i64: 16, 128>}, {pipeline_mode = #tpu.pipeline_mode<synchronous>, transform_indices = @transform_2, window_bounds = array<i64: 1, 128>}, {pipeline_mode = #tpu.pipeline_mode<synchronous>, transform_indices = @transform_3, window_bounds = array<i64: 128, 128>}, {pipeline_mode = #tpu.pipeline_mode<synchronous>, transform_indices = @transform_4, window_bounds = array<i64: 1, 128>}, {transform_indices = @transform_5, window_bounds = array<i64: 32, 128>}]} {
    %c0 = arith.constant 0 : index
    %c0_0 = arith.constant 0 : index
    %0 = vector.load %arg1[%c0, %c0_0] : memref<32x16xbf16, #tpu.memory_space<vmem>>, vector<32x16xbf16>
    %c0_1 = arith.constant 0 : index
    %c0_2 = arith.constant 0 : index
    %1 = vector.load %arg2[%c0_1, %c0_2] : memref<16x128xbf16, #tpu.memory_space<vmem>>, vector<16x128xbf16>
    %cst = arith.constant dense<0.000000e+00> : vector<32x128xf32>
    %2 = tpu.matmul %0, %1, %cst {dimension_numbers = #tpu.dot_dimension_numbers<[1], [0], [0], [1], [0, 0, 1, 1], [], []>} : vector<32x16xbf16>, vector<16x128xbf16>, vector<32x128xf32> -> vector<32x128xf32>
    %c0_3 = arith.constant 0 : index
    %c0_4 = arith.constant 0 : index
    %3 = vector.load %arg3[%c0_3, %c0_4] : memref<1x128xf32, #tpu.memory_space<vmem>>, vector<1x128xf32>
    %4 = vector.broadcast %3 : vector<1x128xf32> to vector<32x128xf32>
    %5 = arith.addf %2, %4 : vector<32x128xf32>
    %cst_5 = arith.constant 0.000000e+00 : f32
    %6 = vector.broadcast %cst_5 : f32 to vector<32x128xf32>
    %7 = arith.maximumf %5, %6 : vector<32x128xf32>
    %8 = arith.truncf %7 : vector<32x128xf32> to vector<32x128xbf16>
    %c0_6 = arith.constant 0 : index
    %c0_7 = arith.constant 0 : index
    %9 = vector.load %arg4[%c0_6, %c0_7] : memref<128x128xbf16, #tpu.memory_space<vmem>>, vector<128x128xbf16>
    %cst_8 = arith.constant dense<0.000000e+00> : vector<32x128xf32>
    %10 = tpu.matmul %8, %9, %cst_8 {dimension_numbers = #tpu.dot_dimension_numbers<[1], [0], [0], [1], [0, 0, 1, 1], [], []>} : vector<32x128xbf16>, vector<128x128xbf16>, vector<32x128xf32> -> vector<32x128xf32>
    %c0_9 = arith.constant 0 : index
    %c0_10 = arith.constant 0 : index
    %11 = vector.load %arg5[%c0_9, %c0_10] : memref<1x128xf32, #tpu.memory_space<vmem>>, vector<1x128xf32>
    %12 = vector.broadcast %11 : vector<1x128xf32> to vector<32x128xf32>
    %13 = arith.addf %10, %12 : vector<32x128xf32>
    %c0_11 = arith.constant 0 : index
    %c0_12 = arith.constant 0 : index
    %14 = vector.load %arg6[%c0_11, %c0_12] : memref<32x128xf32, #tpu.memory_space<vmem>>, vector<32x128xf32>
    tpu.vector_store %arg6[%c0_11, %c0_12], %13 {strides = array<i32>} : memref<32x128xf32, #tpu.memory_space<vmem>>, vector<32x128xf32>,
    return
  }
  func.func @transform_0(%arg0: i32) -> (i32, i32) {
    %c0_i32 = arith.constant 0 : i32
    %c0_i32_0 = arith.constant 0 : i32
    return %arg0, %c0_i32 : i32, i32
  }
  func.func @transform_1(%arg0: i32) -> (i32, i32) {
    %c0_i32 = arith.constant 0 : i32
    %c0_i32_0 = arith.constant 0 : i32
    %c0_i32_1 = arith.constant 0 : i32
    return %c0_i32, %c0_i32_0 : i32, i32
  }
  func.func @transform_2(%arg0: i32) -> (i32, i32) {
    %c0_i32 = arith.constant 0 : i32
    %c0_i32_0 = arith.constant 0 : i32
    %c0_i32_1 = arith.constant 0 : i32
    return %c0_i32, %c0_i32_0 : i32, i32
  }
  func.func @transform_3(%arg0: i32) -> (i32, i32) {
    %c0_i32 = arith.constant 0 : i32
    %c0_i32_0 = arith.constant 0 : i32
    %c0_i32_1 = arith.constant 0 : i32
    return %c0_i32, %c0_i32_0 : i32, i32
  }
  func.func @transform_4(%arg0: i32) -> (i32, i32) {
    %c0_i32 = arith.constant 0 : i32
    %c0_i32_0 = arith.constant 0 : i32
    %c0_i32_1 = arith.constant 0 : i32
    return %c0_i32, %c0_i32_0 : i32, i32
  }
  func.func @transform_5(%arg0: i32) -> (i32, i32) {
    %c0_i32 = arith.constant 0 : i32
    %c0_i32_0 = arith.constant 0 : i32
    return %arg0, %c0_i32 : i32, i32
  }
}

</mosaic_0001>

<bundles_post_ra>
// kernel: tpu_custom_call.1
= control target key start
LH: loop header
LB: loop body
LE: loop exit
PB: predicated region body
PF: predicated region fallthrough
CT: control target
= control target key end

     0   :  { %10 = vsyncpa [#allocation3], 0  ;;  %s866_s0 = inlined_call_operand.vmem [shape: bf16[128,16], index: 0, kind: input, shape index: {}]   ;;  %s867_s1 = inlined_call_operand.vmem [shape: bf16[16,128], index: 1, kind: input, shape index: {}]   ;;  %s868_s2 = inlined_call_operand.vmem [shape: f32[1,128], index: 2, kind: input, shape index: {}]   ;;  %s869_s3 = inlined_call_operand.vmem [shape: bf16[128,128], index: 3, kind: input, shape index: {}]   ;;  %s870_s4 = inlined_call_operand.vmem [shape: f32[1,128], index: 4, kind: input, shape index: {}]   ;;  %s871_s5 = inlined_call_operand.hbm [shape: f32[128,128], index: 5, kind: output, shape index: {}]  }
   0x1   :  { %12 = vsyncpa [#allocation3 + $0x1], 0  ;;  %s732_s18 = smov 0   ;;  %s734_s19 = smov 0  }
   0x2   :  { %s736_s20 = smov 0   ;;  %s738_s21 = smov 0  }
   0x3 LB: > { %s753_s22 = sadd.s32 4294967295, %s697_s21   ;;  %s518_s23 = sadd.s32 4294967294, %s697_s21   ;;  %s697_s21 = sphi %s738_s21, %s877_s21   ;;  %s693_s20 = sphi %s736_s20, %s876_s20   ;;  %s689_s19 = sphi %s734_s19, %s875_s19   ;;  %s685_s18 = sphi %s732_s18, %s874_s18  }
   0x4   : > { %s757_s24 = sadd.s32 1, %s697_s21   ;;  %s135_s25 = sadd.s32 1, %s693_s20 }
   0x5   : > { %s132_s26 = ssub.s32 %s697_s21, %s757_s24  ;;  %p145_p0 = scmp.ne.s32.totalorder %s693_s20, %s689_s19 }
   0x6   : > { %p133_p1 = scmp.eq.s32.totalorder %s132_s26, 0  ;;  %p146_p2 = scmp.eq.s32.totalorder %s753_s22, 3 }
   0x7   : > { %p151_p3 = scmp.ne.s32.totalorder %s689_s19, %s685_s18  ;;  %p152_p4 = scmp.eq.s32.totalorder %s518_s23, 3 }
   0x8   : > { %s768_s27 = scalar_select %p133_p1, %s693_s20, %s135_s25  }
   0x9   : > { %p770_p5 = por %p146_p2, %p145_p0  ;;  %p774_p6 = por %p152_p4, %p151_p3 }
   0xa   : > { %p521_p7 = scmp.ge.s32.totalorder %s697_s21, 1  ;;  %p191_p8 = scmp.lt.s32.totalorder %s697_s21, 5 }
   0xc   : > { %p192_p9 = pnand %p521_p7, %p191_p8 }
   0xd   : > { %s523_s7 = sshll.u32 (!%p192_p9), %s753_s22, 2  ;;  %s216_s14 = sand.u32 (!%p192_p9), 1, %s689_s19  }
   0xe   : > { %195 = sbr.rel (%p192_p9) target bundleno = 445 (0x1bd), region = 40  ;;  %p220_p10 = scmp.lt.s32.totalorder (!%p192_p9), %s523_s7, 15 }
   0xf   : > { %s545_s26 = sshll.u32 (!%p192_p9), %s753_s22, 9  ;;  %s826_s8 = scalar_lea.sflag (!%p192_p9), [#allocation3], %s216_s14 }
  0x10   : > { %s699_s9 = smov (!%p192_p9), [#allocation2]  }
  0x11   : > { %s641_s10 = sshll.u32 (!%p192_p9), %s699_s9, 4  ;;  %s642_s10 = int_to_ptr.vmem [resolvable:$false] %s641_s10 }
  0x12   : > { %s643_s11 = scalar_lea.vmem (!%p192_p9), %s642_s10, 1024 }
  0x13   : > { %v626_v0 = vld [vmem:[%s867_s1] sm:$0xff]   ;;  %v629_v1 = vld [vmem:[%s869_s3 + $0x38] sm:$0xff]   ;;  %s879_s7 = smov (!%p220_p10, %s523_s7), 15  ;;  %v630_v2 = vld [vmem:[%s869_s3 + $0x30] sm:$0xff]   ;;  %vm256_vm0 = vcmask 130048  }
  0x14   : > { %559 = vmatprep.subr.bf16.mxu0 %v626_v0  ;;  %565 = vmatprep.subr.bf16.mxu1 %v629_v1  ;;  %s524_s12 = sshll.u32 %s879_s7, 2  ;;  %v631_v3 = vld [vmem:[%s869_s3 + $0x28] sm:$0xff]   ;;  %v632_v6 = vld [vmem:[%s869_s3 + $0x20] sm:$0xff]   ;;  %v633_v7 = vld [vmem:[%s869_s3 + $0x18] sm:$0xff]   ;;  %s824_s7 = scalar_lea.hbm %s871_s5, %s545_s26 }
  0x15   : > { %560 = vmatpush3.bf16.msra.mxu0 %v626_v0  ;;  %566 = vmatpush3.bf16.msra.mxu1 %v629_v1  ;;  %s223_s15 = scalar_lea.vmem %s866_s0, %s524_s12  ;;  %v634_v8 = vld [vmem:[%s869_s3 + $0x10] sm:$0xff]   ;;  %v635_v9 = vld [vmem:[%s869_s3 + $0x8] sm:$0xff]   ;;  %v636_v10 = vld [vmem:[%s869_s3] sm:$0xff]  }
  0x16   : > { %567 = vmatprep.subr.bf16.mxu1 %v630_v2  ;;  %v627_v4 = vld [vmem:[%s223_s15] sm:$0xff]   ;;  %v628_v5 = vld [vmem:[%s223_s15 + $0x8] sm:$0xff]   ;;  %s522_s15 = sshll.u32 %s216_s14, 5 }
  0x17   : > { %561 = vmatprep.mubr.msk.bf16.mxu0 %vm256_vm0, %v627_v4  ;;  %v525_v13 = vld [vmem:[%s868_s2] ss:$0 sm:$0xff]  ;;  %s218_s23 = scalar_lea.vmem [#allocation2], %s522_s15 }
  0x18   : > { %562 = vmatmul.mubr.msk.bf16.vlgmr.msra.gmra.mxu0 %vm256_vm0, %v628_v5  ;;  %v531_v26 = vld [vmem:[%s870_s4] ss:$0 sm:$0xff]  ;;  %s456_s25 = sshll.u32 %s218_s23, 4  ;;  %s819_s25 = int_to_ptr.vmem [resolvable:$true] %s456_s25 }
  0x19   : > { %568 = vmatpush3.bf16.msra.mxu1 %v630_v2  ;;  %s637_s22 = scalar_lea.vmem %s819_s25, 512  ;;  %p644_p0 = scmp.lt.s32.totalorder %s819_s25, %s642_s10 }
  0x1a   : > { %569 = vmatprep.subr.bf16.mxu1 %v631_v3  ;;  %p638_p11 = scmp.ne.s32.totalorder %s819_s25, %s637_s22  ;;  %p645_p1 = scmp.lt.s32.totalorder %s643_s11, %s637_s22 }
  0x1c   : > { %p639_p12 = pnand %p638_p11, %p770_p5  ;;  %p646_p2 = por %p645_p1, %p644_p0 }
  0x1d   : > { %570 = vmatpush3.bf16.msra.mxu1 %v631_v3 }
  0x1e   : > { %571 = vmatprep.subr.bf16.mxu1 %v632_v6  ;;  %p640_p13 = pneg %p639_p12 }
  0x20   : > { %p647_p3 = pnand %p646_p2, %p640_p13 }
  0x21   : > { %572 = vmatpush3.bf16.msra.mxu1 %v632_v6 }
  0x22   : > { %573 = vmatprep.subr.bf16.mxu1 %v633_v7 }
  0x25   : > { %574 = vmatpush3.bf16.msra.mxu1 %v633_v7 }
  0x26   : > { %575 = vmatprep.subr.bf16.mxu1 %v634_v8 }
  0x29   : > { %576 = vmatpush3.bf16.msra.mxu1 %v634_v8 }
  0x2a   : > { %577 = vmatprep.subr.bf16.mxu1 %v635_v9 }
  0x2d   : > { %578 = vmatpush3.bf16.msra.mxu1 %v635_v9 }
  0x2e   : > { %579 = vmatprep.subr.bf16.mxu1 %v636_v10 }
  0x31   : > { %580 = vmatpush3.bf16.msra.mxu1 %v636_v10 }
  0xd8   : > { %v563_v11 = vpop.f32.mrf.mxu0 }
  0xd9   : > { %v306_v17 = vadd.f32 %v563_v11, %v525_v13 }
  0xda   : > { %v297_v12 = vpop.f32.mrf.mxu0 }
  0xdb   : > { %v298_v15 = vadd.f32 %v525_v13, %v297_v12  ;;  %v314_v23 = vmax.f32 %v306_v17, 0.0 }
  0xdc   : > { %v564_v14 = vpop.f32.mrf.mxu0 }
  0xdd   : > { %v309_v16 = vadd.f32 %v564_v14, %v525_v13  ;;  %v312_v21 = vmax.f32 %v298_v15, 0.0 }
  0xde   : > { %v300_v18 = vpop.f32.mrf.mxu0 }
  0xdf   : > { %v301_v19 = vadd.f32 %v525_v13, %v300_v18  ;;  %v315_v20 = vmax.f32 %v309_v16, 0.0 }
  0xe1   : > { %v313_v22 = vmax.f32 %v301_v19, 0.0  ;;  %v317_v25 = vpack.c.bf16 %v315_v20, %v314_v23 }
  0xe3   : > { %v316_v24 = vpack.c.bf16 %v313_v22, %v312_v21 }
  0xe5   : > { %581 = vmatprep.mubr.bf16.mxu1 %v316_v24 }
  0xe6   : > { %582 = vmatmul.mubr.bf16.vlgmr.msra.gmra.mxu1 %v317_v25 }
 0x1a6   : > { %v583_v27 = vpop.f32.mrf.mxu1 }
 0x1a7   : > { %v432_v28 = vadd.f32 %v583_v27, %v531_v26 }
 0x1a8   : > { %v423_v29 = vpop.f32.mrf.mxu1 }
 0x1a9   : > { %440 = vst [vmem:[%s218_s23 + $0x10] sm:$0xff] %v432_v28  ;;  %v424_v30 = vadd.f32 %v531_v26, %v423_v29 }
 0x1aa   : > { %v584_v31 = vpop.f32.mrf.mxu1 }
 0x1ab   : > { %438 = vst [vmem:[%s218_s23] sm:$0xff] %v424_v30  ;;  %v435_v32 = vadd.f32 %v584_v31, %v531_v26 }
 0x1ac   : > { %v426_v33 = vpop.f32.mrf.mxu1 }
 0x1ad   : > { %441 = vst [vmem:[%s218_s23 + $0x18] sm:$0xff] %v435_v32  ;;  %v427_v34 = vadd.f32 %v531_v26, %v426_v33 }
 0x1af   : > { %439 = vst [vmem:[%s218_s23 + $0x8] sm:$0xff] %v427_v34 }
 0x1b0   : > { %650 = shalt.err (!%p647_p3)
}
 0x1b1   : > { %s651_s12 = scalar_lea.hbm %s824_s7, 512  ;;  %s655_s15 = scalar_lea.hbm %s871_s5, 2048 }
 0x1b2   : > { %p652_p4 = scmp.ne.s32.totalorder %s824_s7, %s651_s12  ;;  %p656_p9 = scmp.lt.s32.totalorder %s824_s7, %s871_s5 }
 0x1b3   : > { %p657_p10 = scmp.lt.s32.totalorder %s655_s15, %s651_s12 }
 0x1b4   : > { %p653_p7 = pnand %p652_p4, %p770_p5 }
 0x1b5   : > { %p658_p11 = por %p657_p10, %p656_p9 }
 0x1b6   : > { %p654_p8 = pneg %p653_p7 }
 0x1b8   : > { %p659_p12 = pnand %p658_p11, %p654_p8 }
 0x1ba   : > { %662 = shalt.err (!%p659_p12)
}
 0x1bb   : > { %s700_s23 = smov 128   ;;  %s701_s26 = smov 8  }
 0x1bc   : > { %585 = dma.vmem_to_hbm [thread:$0]  (%p770_p5), %s819_s25, 512, %s824_s7, %s826_s8, %s700_s23, %s700_s23, %s701_s26  }
 0x1bd PF: > { %p591_p13 = scmp.ge.s32.totalorder %s697_s21, 2  ;;  %s471_s30 = sand.u32 1, %s685_s18  }
 0x1be   : > { %s472_s6 = scalar_lea.sflag [#allocation3], %s471_s30 }
 0x1bf   : > { %p588_p0 = pnand %p591_p13, %p774_p6 }
 0x1c1   : > { %p589_p1 = pneg %p588_p0 }
 0x1c3   : > { %680 = dma.done.wait (%p589_p1), %s472_s6, 512  }
 0x1c4   : > { %682 = vsyncadd (%p589_p1), %s472_s6, 4294966784  ;;  %p15_p2 = scmp.ge.s32.totalorder %s757_s24, 6   ;;  %s874_s18 = smov %s689_s19 }
 0x1c5   : > { %s875_s19 = smov %s693_s20  ;;  %s876_s20 = smov %s768_s27 }
 0x1c6   : > { %s877_s21 = smov %s757_s24  ;;  %17 = sbr.rel (!%p15_p2) target bundleno = 3 (0x3), region = 75 }
 0x1cb   :  { %477 = vsyncpa [#allocation3], 1 }
 0x1cc   :  { %479 = vsyncpa [#allocation3 + $0x1], 1 }

</bundles_post_ra>
